<compile_context>
chip_gen: v6e
topology: v6e:2x2x1
jax: 0.10.0
libtpu: 0.0.40
codegen_flags: <defaults>
</compile_context>

<pallas_src>
import functools

import numpy as np
import jax
import jax.numpy as jnp
from jax.experimental import pallas as pl
from jax.experimental.pallas import tpu as pltpu

# torch `color_projection` constant (output channel d = sum_c proj[d, c] * img[c]).
COLOR_PROJECTION = ((0.26, 0.09, 0.02),
                    (0.27, 0.00, -0.05),
                    (0.27, -0.09, 0.03))


def _make_image_kernel(c, proj_rows):
    """Builds the per-batch-element kernel.

    proj_rows: tuple-of-tuples of Python floats (c, c) folded in as immediate
               scalar constants, or None for decorrelate=False (identity mix).
    """

    def kernel(sr_ref, si_ref, a_ref, b_ref, cr_ref, cn_ref, out_ref):
        # sr_ref/si_ref: (C, H, WF) real/imag spectrum of one image
        # a_ref/b_ref:   (H, H)  cos/sin row-DFT  (ifft along H, incl. 1/H)
        # cr_ref/cn_ref: (WF, W) cos/sin col-DFT  (irfft along W, incl. Hermitian
        #                        doubling weights, 1/W and the module's /4)
        # out_ref:       (C, H, W) sigmoid(image)
        a = a_ref[...]
        b = b_ref[...]
        cr = cr_ref[...]
        cn = cn_ref[...]
        # Per-channel 2-D tiles (avoids 3-D relayouts inside the kernel).
        sr = [sr_ref[i] for i in range(c)]
        si = [si_ref[i] for i in range(c)]
        for d in range(c):
            if proj_rows is None:
                src, sic = sr[d], si[d]
            else:
                # 3x3 color decorrelation folded onto the spectrum (linear ->
                # commutes with the irfft); rides free in VPU slots.
                row = proj_rows[d]
                src = row[0] * sr[0]
                sic = row[0] * si[0]
                for cc in range(1, c):
                    src = src + row[cc] * sr[cc]
                    sic = sic + row[cc] * si[cc]
            # Stage 1: inverse FFT along H (complex):  T = (A + iB) @ S.
            tr = (jnp.dot(a, src, preferred_element_type=jnp.float32)
                  - jnp.dot(b, sic, preferred_element_type=jnp.float32))
            ti = (jnp.dot(a, sic, preferred_element_type=jnp.float32)
                  + jnp.dot(b, src, preferred_element_type=jnp.float32))
            # Stage 2: inverse real FFT along W (+ the /4):  img = Tr@Cr - Ti@Cn.
            img = (jnp.dot(tr, cr, preferred_element_type=jnp.float32)
                   - jnp.dot(ti, cn, preferred_element_type=jnp.float32))
            out_ref[d] = jax.nn.sigmoid(img)

    return kernel


@functools.lru_cache(maxsize=None)
def _dft_matrices(h, w):
    """Separable irfft2 factors, cached per (h, w), device_put exactly once.

    For a complex half spectrum S = Sr + i*Si of shape (h, wf), wf = w//2 + 1
    (even w), with Tr = A@Sr - B@Si and Ti = A@Si + B@Sr:
        irfft2(S) / 4 == Tr @ Cr - Ti @ Cn
    """
    wf = w // 2 + 1
    y = np.arange(h, dtype=np.float64)[:, None]
    ky = np.arange(h, dtype=np.float64)[None, :]
    ang_y = 2.0 * np.pi * y * ky / h
    a = np.cos(ang_y) / h                                  # (h, h)  [y, ky]
    b = np.sin(ang_y) / h
    kx = np.arange(wf, dtype=np.float64)[:, None]
    x = np.arange(w, dtype=np.float64)[None, :]
    ang_x = 2.0 * np.pi * kx * x / w
    g = np.where((kx == 0) | (kx == w // 2), 1.0, 2.0)      # Hermitian doubling
    cr = g * np.cos(ang_x) / (4.0 * w)                      # (wf, w) [kx, x]; /4 folded
    cn = g * np.sin(ang_x) / (4.0 * w)
    return tuple(jax.device_put(m.astype(np.float32)) for m in (a, b, cr, cn))


@functools.partial(jax.jit, static_argnames=("decorrelate",))
def _image_forward_jit(spectrum, a, b, cr, cn, decorrelate):
    bsz, c, h, wf = spectrum.shape
    w = cr.shape[1]
    if decorrelate:
        assert c == len(COLOR_PROJECTION)
        proj_rows = COLOR_PROJECTION
    else:
        proj_rows = None

    # Only remaining wrapper op: complex64 -> (f32, f32) split (no complex refs).
    sr = jnp.real(spectrum).astype(jnp.float32)
    si = jnp.imag(spectrum).astype(jnp.float32)

    kernel = _make_image_kernel(c, proj_rows)
    spec_in = pl.BlockSpec((None, c, h, wf), lambda i: (i, 0, 0, 0))
    const_spec = lambda shape: pl.BlockSpec(shape, lambda i: (0, 0))

    out = pl.pallas_call(
        kernel,
        grid=(bsz,),
        in_specs=[
            spec_in,                  # Re(spectrum), one image per grid step
            spec_in,                  # Im(spectrum)
            const_spec((h, h)),       # A  (constant index_map -> stays resident)
            const_spec((h, h)),       # B
            const_spec((wf, w)),      # Cr
            const_spec((wf, w)),      # Cn
        ],
        out_specs=pl.BlockSpec((None, c, h, w), lambda i: (i, 0, 0, 0)),
        out_shape=jax.ShapeDtypeStruct((bsz, c, h, w), jnp.float32),
        compiler_params=pltpu.CompilerParams(
            dimension_semantics=("parallel",)),
    )(sr, si, a, b, cr, cn)
    return out


def image_forward(spectrum, decorrelate=True):
    """spectrum: complex64 (B, C, H, WF), WF = W//2 + 1 (even W, as in `Image`).
    Returns float32 (B, C, H, W):
        sigmoid(to_rgb(irfft2(spectrum)[..., :H, :W] / 4, decorrelate))."""
    _, _, h, wf = spectrum.shape
    w = 2 * (wf - 1)          # even-W module (Image uses W=16); odd W unsupported
    a, b, cr, cn = _dft_matrices(h, w)
    return _image_forward_jit(spectrum, a, b, cr, cn, decorrelate)


def init_fourier_spectrum(key, shape, std=1.0):
    """Deterministic re-implementation of FourierImage.__init__ parameter init."""
    b, c, h, w = shape
    fy = jnp.fft.fftfreq(h)[:, None]
    fx = jnp.fft.fftfreq(w)[: w // 2 + 1]          # even w
    freq = jnp.sqrt(fx ** 2 + fy ** 2)             # (h, w//2+1)
    init_val = jax.random.normal(key, (2, b, c) + freq.shape, dtype=jnp.float32) * std
    spectrum = init_val[0] + 1j * init_val[1]
    scale = 1.0 / jnp.maximum(freq, 1.0 / max(h, w))
    scale = scale * jnp.sqrt(jnp.float32(w * h))
    return (spectrum * scale).astype(jnp.complex64)


if __name__ == "__main__":
    H = W = 16                                     # Image(w=16) -> (1, 3, 16, 16)
    key = jax.random.PRNGKey(0)
    spectrum = init_fourier_spectrum(key, (1, 3, H, W), std=1.0)

    out = jax.block_until_ready(image_forward(spectrum, decorrelate=True))
    assert out.shape == (1, 3, H, W)

    # pure-numpy reference (FourierImage.forward + to_rgb with sigmoid)
    spec_np = np.array(spectrum)
    img_ref = np.fft.irfft2(spec_np)[:, :, :H, :W] / 4.0
    proj = np.array(COLOR_PROJECTION, dtype=np.float32)
    ref = 1.0 / (1.0 + np.exp(-np.einsum("bchw,dc->bdhw", img_ref, proj)))
    np.testing.assert_allclose(np.array(out), ref.astype(np.float32),
                               rtol=1e-4, atol=1e-4)

    # Also exercise decorrelate=False and batch > 1 (gridded path).
    spectrum2 = init_fourier_spectrum(jax.random.PRNGKey(1), (2, 3, H, W), std=1.0)
    out2 = jax.block_until_ready(image_forward(spectrum2, decorrelate=False))
    img_ref2 = np.fft.irfft2(np.array(spectrum2))[:, :, :H, :W] / 4.0
    ref2 = 1.0 / (1.0 + np.exp(-img_ref2))
    np.testing.assert_allclose(np.array(out2), ref2.astype(np.float32),
                               rtol=1e-4, atol=1e-4)

    print("KERNEL_OK")
</pallas_src>

<mosaic_0001>
module attributes {stable_mosaic.version = 11 : i64} {
  func.func @kernel(%arg0: i32, %arg1: memref<1x3x16x9xf32, #tpu.memory_space<vmem>>, %arg2: memref<1x3x16x9xf32, #tpu.memory_space<vmem>>, %arg3: memref<16x16xf32, #tpu.memory_space<vmem>>, %arg4: memref<16x16xf32, #tpu.memory_space<vmem>>, %arg5: memref<9x16xf32, #tpu.memory_space<vmem>>, %arg6: memref<9x16xf32, #tpu.memory_space<vmem>>, %arg7: memref<1x3x16x16xf32, #tpu.memory_space<vmem>>) attributes {dimension_semantics = [#tpu.dimension_semantics<parallel>], iteration_bounds = array<i64: 1>, scalar_prefetch = 0 : i64, scratch_operands = 0 : i64, tpu.core_type = #tpu.core_type<tc>, window_params = [{transform_indices = @transform_0, window_bounds = array<i64: 1, 3, 16, 9>}, {transform_indices = @transform_1, window_bounds = array<i64: 1, 3, 16, 9>}, {pipeline_mode = #tpu.pipeline_mode<synchronous>, transform_indices = @transform_2, window_bounds = array<i64: 16, 16>}, {pipeline_mode = #tpu.pipeline_mode<synchronous>, transform_indices = @transform_3, window_bounds = array<i64: 16, 16>}, {pipeline_mode = #tpu.pipeline_mode<synchronous>, transform_indices = @transform_4, window_bounds = array<i64: 9, 16>}, {pipeline_mode = #tpu.pipeline_mode<synchronous>, transform_indices = @transform_5, window_bounds = array<i64: 9, 16>}, {transform_indices = @transform_6, window_bounds = array<i64: 1, 3, 16, 16>}]} {
    %c0 = arith.constant 0 : index
    %c0_0 = arith.constant 0 : index
    %0 = vector.load %arg3[%c0, %c0_0] : memref<16x16xf32, #tpu.memory_space<vmem>>, vector<16x16xf32>
    %c0_1 = arith.constant 0 : index
    %c0_2 = arith.constant 0 : index
    %1 = vector.load %arg4[%c0_1, %c0_2] : memref<16x16xf32, #tpu.memory_space<vmem>>, vector<16x16xf32>
    %c0_3 = arith.constant 0 : index
    %c0_4 = arith.constant 0 : index
    %2 = vector.load %arg5[%c0_3, %c0_4] : memref<9x16xf32, #tpu.memory_space<vmem>>, vector<9x16xf32>
    %c0_5 = arith.constant 0 : index
    %c0_6 = arith.constant 0 : index
    %3 = vector.load %arg6[%c0_5, %c0_6] : memref<9x16xf32, #tpu.memory_space<vmem>>, vector<9x16xf32>
    %c0_7 = arith.constant 0 : index
    %c0_8 = arith.constant 0 : index
    %c0_9 = arith.constant 0 : index
    %c0_10 = arith.constant 0 : index
    %4 = vector.load %arg1[%c0_7, %c0_8, %c0_9, %c0_10] : memref<1x3x16x9xf32, #tpu.memory_space<vmem>>, vector<1x1x16x9xf32>
    %5 = vector.shape_cast %4 : vector<1x1x16x9xf32> to vector<16x9xf32>
    %c0_11 = arith.constant 0 : index
    %c1 = arith.constant 1 : index
    %c0_12 = arith.constant 0 : index
    %c0_13 = arith.constant 0 : index
    %6 = vector.load %arg1[%c0_11, %c1, %c0_12, %c0_13] : memref<1x3x16x9xf32, #tpu.memory_space<vmem>>, vector<1x1x16x9xf32>
    %7 = vector.shape_cast %6 : vector<1x1x16x9xf32> to vector<16x9xf32>
    %c0_14 = arith.constant 0 : index
    %c2 = arith.constant 2 : index
    %c0_15 = arith.constant 0 : index
    %c0_16 = arith.constant 0 : index
    %8 = vector.load %arg1[%c0_14, %c2, %c0_15, %c0_16] : memref<1x3x16x9xf32, #tpu.memory_space<vmem>>, vector<1x1x16x9xf32>
    %9 = vector.shape_cast %8 : vector<1x1x16x9xf32> to vector<16x9xf32>
    %c0_17 = arith.constant 0 : index
    %c0_18 = arith.constant 0 : index
    %c0_19 = arith.constant 0 : index
    %c0_20 = arith.constant 0 : index
    %10 = vector.load %arg2[%c0_17, %c0_18, %c0_19, %c0_20] : memref<1x3x16x9xf32, #tpu.memory_space<vmem>>, vector<1x1x16x9xf32>
    %11 = vector.shape_cast %10 : vector<1x1x16x9xf32> to vector<16x9xf32>
    %c0_21 = arith.constant 0 : index
    %c1_22 = arith.constant 1 : index
    %c0_23 = arith.constant 0 : index
    %c0_24 = arith.constant 0 : index
    %12 = vector.load %arg2[%c0_21, %c1_22, %c0_23, %c0_24] : memref<1x3x16x9xf32, #tpu.memory_space<vmem>>, vector<1x1x16x9xf32>
    %13 = vector.shape_cast %12 : vector<1x1x16x9xf32> to vector<16x9xf32>
    %c0_25 = arith.constant 0 : index
    %c2_26 = arith.constant 2 : index
    %c0_27 = arith.constant 0 : index
    %c0_28 = arith.constant 0 : index
    %14 = vector.load %arg2[%c0_25, %c2_26, %c0_27, %c0_28] : memref<1x3x16x9xf32, #tpu.memory_space<vmem>>, vector<1x1x16x9xf32>
    %15 = vector.shape_cast %14 : vector<1x1x16x9xf32> to vector<16x9xf32>
    %cst = arith.constant 2.600000e-01 : f32
    %16 = vector.broadcast %cst : f32 to vector<16x9xf32>
    %17 = arith.mulf %16, %5 : vector<16x9xf32>
    %cst_29 = arith.constant 2.600000e-01 : f32
    %18 = vector.broadcast %cst_29 : f32 to vector<16x9xf32>
    %19 = arith.mulf %18, %11 : vector<16x9xf32>
    %cst_30 = arith.constant 9.000000e-02 : f32
    %20 = vector.broadcast %cst_30 : f32 to vector<16x9xf32>
    %21 = arith.mulf %20, %7 : vector<16x9xf32>
    %22 = arith.addf %17, %21 : vector<16x9xf32>
    %cst_31 = arith.constant 9.000000e-02 : f32
    %23 = vector.broadcast %cst_31 : f32 to vector<16x9xf32>
    %24 = arith.mulf %23, %13 : vector<16x9xf32>
    %25 = arith.addf %19, %24 : vector<16x9xf32>
    %cst_32 = arith.constant 2.000000e-02 : f32
    %26 = vector.broadcast %cst_32 : f32 to vector<16x9xf32>
    %27 = arith.mulf %26, %9 : vector<16x9xf32>
    %28 = arith.addf %22, %27 : vector<16x9xf32>
    %cst_33 = arith.constant 2.000000e-02 : f32
    %29 = vector.broadcast %cst_33 : f32 to vector<16x9xf32>
    %30 = arith.mulf %29, %15 : vector<16x9xf32>
    %31 = arith.addf %25, %30 : vector<16x9xf32>
    %cst_34 = arith.constant dense<0.000000e+00> : vector<16x9xf32>
    %32 = tpu.matmul %0, %28, %cst_34 {dimension_numbers = #tpu.dot_dimension_numbers<[1], [0], [0], [1], [0, 0, 1, 1], [], []>} : vector<16x16xf32>, vector<16x9xf32>, vector<16x9xf32> -> vector<16x9xf32>
    %cst_35 = arith.constant dense<0.000000e+00> : vector<16x9xf32>
    %33 = tpu.matmul %1, %31, %cst_35 {dimension_numbers = #tpu.dot_dimension_numbers<[1], [0], [0], [1], [0, 0, 1, 1], [], []>} : vector<16x16xf32>, vector<16x9xf32>, vector<16x9xf32> -> vector<16x9xf32>
    %34 = arith.subf %32, %33 : vector<16x9xf32>
    %cst_36 = arith.constant dense<0.000000e+00> : vector<16x9xf32>
    %35 = tpu.matmul %0, %31, %cst_36 {dimension_numbers = #tpu.dot_dimension_numbers<[1], [0], [0], [1], [0, 0, 1, 1], [], []>} : vector<16x16xf32>, vector<16x9xf32>, vector<16x9xf32> -> vector<16x9xf32>
    %cst_37 = arith.constant dense<0.000000e+00> : vector<16x9xf32>
    %36 = tpu.matmul %1, %28, %cst_37 {dimension_numbers = #tpu.dot_dimension_numbers<[1], [0], [0], [1], [0, 0, 1, 1], [], []>} : vector<16x16xf32>, vector<16x9xf32>, vector<16x9xf32> -> vector<16x9xf32>
    %37 = arith.addf %35, %36 : vector<16x9xf32>
    %cst_38 = arith.constant dense<0.000000e+00> : vector<16x16xf32>
    %38 = tpu.matmul %34, %2, %cst_38 {dimension_numbers = #tpu.dot_dimension_numbers<[1], [0], [0], [1], [0, 0, 1, 1], [], []>} : vector<16x9xf32>, vector<9x16xf32>, vector<16x16xf32> -> vector<16x16xf32>
    %cst_39 = arith.constant dense<0.000000e+00> : vector<16x16xf32>
    %39 = tpu.matmul %37, %3, %cst_39 {dimension_numbers = #tpu.dot_dimension_numbers<[1], [0], [0], [1], [0, 0, 1, 1], [], []>} : vector<16x9xf32>, vector<9x16xf32>, vector<16x16xf32> -> vector<16x16xf32>
    %40 = arith.subf %38, %39 : vector<16x16xf32>
    %41 = arith.negf %40 : vector<16x16xf32>
    %42 = math.exp %41 : vector<16x16xf32>
    %cst_40 = arith.constant 1.000000e+00 : f32
    %43 = vector.broadcast %cst_40 : f32 to vector<16x16xf32>
    %44 = arith.addf %43, %42 : vector<16x16xf32>
    %45 = arith.divf %43, %44 : vector<16x16xf32>
    %c0_41 = arith.constant 0 : index
    %c0_42 = arith.constant 0 : index
    %c0_43 = arith.constant 0 : index
    %c0_44 = arith.constant 0 : index
    %46 = vector.load %arg7[%c0_41, %c0_42, %c0_43, %c0_44] : memref<1x3x16x16xf32, #tpu.memory_space<vmem>>, vector<1x1x16x16xf32>
    %47 = vector.shape_cast %46 : vector<1x1x16x16xf32> to vector<16x16xf32>
    %48 = vector.shape_cast %45 : vector<16x16xf32> to vector<1x1x16x16xf32>
    tpu.vector_store %arg7[%c0_41, %c0_42, %c0_43, %c0_44], %48 {strides = array<i32>} : memref<1x3x16x16xf32, #tpu.memory_space<vmem>>, vector<1x1x16x16xf32>,
    %cst_45 = arith.constant 2.700000e-01 : f32
    %49 = vector.broadcast %cst_45 : f32 to vector<16x9xf32>
    %50 = arith.mulf %49, %5 : vector<16x9xf32>
    %cst_46 = arith.constant 2.700000e-01 : f32
    %51 = vector.broadcast %cst_46 : f32 to vector<16x9xf32>
    %52 = arith.mulf %51, %11 : vector<16x9xf32>
    %cst_47 = arith.constant 0.000000e+00 : f32
    %53 = vector.broadcast %cst_47 : f32 to vector<16x9xf32>
    %54 = arith.mulf %53, %7 : vector<16x9xf32>
    %55 = arith.addf %50, %54 : vector<16x9xf32>
    %cst_48 = arith.constant 0.000000e+00 : f32
    %56 = vector.broadcast %cst_48 : f32 to vector<16x9xf32>
    %57 = arith.mulf %56, %13 : vector<16x9xf32>
    %58 = arith.addf %52, %57 : vector<16x9xf32>
    %cst_49 = arith.constant -5.000000e-02 : f32
    %59 = vector.broadcast %cst_49 : f32 to vector<16x9xf32>
    %60 = arith.mulf %59, %9 : vector<16x9xf32>
    %61 = arith.addf %55, %60 : vector<16x9xf32>
    %cst_50 = arith.constant -5.000000e-02 : f32
    %62 = vector.broadcast %cst_50 : f32 to vector<16x9xf32>
    %63 = arith.mulf %62, %15 : vector<16x9xf32>
    %64 = arith.addf %58, %63 : vector<16x9xf32>
    %cst_51 = arith.constant dense<0.000000e+00> : vector<16x9xf32>
    %65 = tpu.matmul %0, %61, %cst_51 {dimension_numbers = #tpu.dot_dimension_numbers<[1], [0], [0], [1], [0, 0, 1, 1], [], []>} : vector<16x16xf32>, vector<16x9xf32>, vector<16x9xf32> -> vector<16x9xf32>
    %cst_52 = arith.constant dense<0.000000e+00> : vector<16x9xf32>
    %66 = tpu.matmul %1, %64, %cst_52 {dimension_numbers = #tpu.dot_dimension_numbers<[1], [0], [0], [1], [0, 0, 1, 1], [], []>} : vector<16x16xf32>, vector<16x9xf32>, vector<16x9xf32> -> vector<16x9xf32>
    %67 = arith.subf %65, %66 : vector<16x9xf32>
    %cst_53 = arith.constant dense<0.000000e+00> : vector<16x9xf32>
    %68 = tpu.matmul %0, %64, %cst_53 {dimension_numbers = #tpu.dot_dimension_numbers<[1], [0], [0], [1], [0, 0, 1, 1], [], []>} : vector<16x16xf32>, vector<16x9xf32>, vector<16x9xf32> -> vector<16x9xf32>
    %cst_54 = arith.constant dense<0.000000e+00> : vector<16x9xf32>
    %69 = tpu.matmul %1, %61, %cst_54 {dimension_numbers = #tpu.dot_dimension_numbers<[1], [0], [0], [1], [0, 0, 1, 1], [], []>} : vector<16x16xf32>, vector<16x9xf32>, vector<16x9xf32> -> vector<16x9xf32>
    %70 = arith.addf %68, %69 : vector<16x9xf32>
    %cst_55 = arith.constant dense<0.000000e+00> : vector<16x16xf32>
    %71 = tpu.matmul %67, %2, %cst_55 {dimension_numbers = #tpu.dot_dimension_numbers<[1], [0], [0], [1], [0, 0, 1, 1], [], []>} : vector<16x9xf32>, vector<9x16xf32>, vector<16x16xf32> -> vector<16x16xf32>
    %cst_56 = arith.constant dense<0.000000e+00> : vector<16x16xf32>
    %72 = tpu.matmul %70, %3, %cst_56 {dimension_numbers = #tpu.dot_dimension_numbers<[1], [0], [0], [1], [0, 0, 1, 1], [], []>} : vector<16x9xf32>, vector<9x16xf32>, vector<16x16xf32> -> vector<16x16xf32>
    %73 = arith.subf %71, %72 : vector<16x16xf32>
    %74 = arith.negf %73 : vector<16x16xf32>
    %75 = math.exp %74 : vector<16x16xf32>
    %cst_57 = arith.constant 1.000000e+00 : f32
    %76 = vector.broadcast %cst_57 : f32 to vector<16x16xf32>
    %77 = arith.addf %76, %75 : vector<16x16xf32>
    %78 = arith.divf %76, %77 : vector<16x16xf32>
    %c0_58 = arith.constant 0 : index
    %c1_59 = arith.constant 1 : index
    %c0_60 = arith.constant 0 : index
    %c0_61 = arith.constant 0 : index
    %79 = vector.load %arg7[%c0_58, %c1_59, %c0_60, %c0_61] : memref<1x3x16x16xf32, #tpu.memory_space<vmem>>, vector<1x1x16x16xf32>
    %80 = vector.shape_cast %79 : vector<1x1x16x16xf32> to vector<16x16xf32>
    %81 = vector.shape_cast %78 : vector<16x16xf32> to vector<1x1x16x16xf32>
    tpu.vector_store %arg7[%c0_58, %c1_59, %c0_60, %c0_61], %81 {strides = array<i32>} : memref<1x3x16x16xf32, #tpu.memory_space<vmem>>, vector<1x1x16x16xf32>,
    %cst_62 = arith.constant 2.700000e-01 : f32
    %82 = vector.broadcast %cst_62 : f32 to vector<16x9xf32>
    %83 = arith.mulf %82, %5 : vector<16x9xf32>
    %cst_63 = arith.constant 2.700000e-01 : f32
    %84 = vector.broadcast %cst_63 : f32 to vector<16x9xf32>
    %85 = arith.mulf %84, %11 : vector<16x9xf32>
    %cst_64 = arith.constant -9.000000e-02 : f32
    %86 = vector.broadcast %cst_64 : f32 to vector<16x9xf32>
    %87 = arith.mulf %86, %7 : vector<16x9xf32>
    %88 = arith.addf %83, %87 : vector<16x9xf32>
    %cst_65 = arith.constant -9.000000e-02 : f32
    %89 = vector.broadcast %cst_65 : f32 to vector<16x9xf32>
    %90 = arith.mulf %89, %13 : vector<16x9xf32>
    %91 = arith.addf %85, %90 : vector<16x9xf32>
    %cst_66 = arith.constant 3.000000e-02 : f32
    %92 = vector.broadcast %cst_66 : f32 to vector<16x9xf32>
    %93 = arith.mulf %92, %9 : vector<16x9xf32>
    %94 = arith.addf %88, %93 : vector<16x9xf32>
    %cst_67 = arith.constant 3.000000e-02 : f32
    %95 = vector.broadcast %cst_67 : f32 to vector<16x9xf32>
    %96 = arith.mulf %95, %15 : vector<16x9xf32>
    %97 = arith.addf %91, %96 : vector<16x9xf32>
    %cst_68 = arith.constant dense<0.000000e+00> : vector<16x9xf32>
    %98 = tpu.matmul %0, %94, %cst_68 {dimension_numbers = #tpu.dot_dimension_numbers<[1], [0], [0], [1], [0, 0, 1, 1], [], []>} : vector<16x16xf32>, vector<16x9xf32>, vector<16x9xf32> -> vector<16x9xf32>
    %cst_69 = arith.constant dense<0.000000e+00> : vector<16x9xf32>
    %99 = tpu.matmul %1, %97, %cst_69 {dimension_numbers = #tpu.dot_dimension_numbers<[1], [0], [0], [1], [0, 0, 1, 1], [], []>} : vector<16x16xf32>, vector<16x9xf32>, vector<16x9xf32> -> vector<16x9xf32>
    %100 = arith.subf %98, %99 : vector<16x9xf32>
    %cst_70 = arith.constant dense<0.000000e+00> : vector<16x9xf32>
    %101 = tpu.matmul %0, %97, %cst_70 {dimension_numbers = #tpu.dot_dimension_numbers<[1], [0], [0], [1], [0, 0, 1, 1], [], []>} : vector<16x16xf32>, vector<16x9xf32>, vector<16x9xf32> -> vector<16x9xf32>
    %cst_71 = arith.constant dense<0.000000e+00> : vector<16x9xf32>
    %102 = tpu.matmul %1, %94, %cst_71 {dimension_numbers = #tpu.dot_dimension_numbers<[1], [0], [0], [1], [0, 0, 1, 1], [], []>} : vector<16x16xf32>, vector<16x9xf32>, vector<16x9xf32> -> vector<16x9xf32>
    %103 = arith.addf %101, %102 : vector<16x9xf32>
    %cst_72 = arith.constant dense<0.000000e+00> : vector<16x16xf32>
    %104 = tpu.matmul %100, %2, %cst_72 {dimension_numbers = #tpu.dot_dimension_numbers<[1], [0], [0], [1], [0, 0, 1, 1], [], []>} : vector<16x9xf32>, vector<9x16xf32>, vector<16x16xf32> -> vector<16x16xf32>
    %cst_73 = arith.constant dense<0.000000e+00> : vector<16x16xf32>
    %105 = tpu.matmul %103, %3, %cst_73 {dimension_numbers = #tpu.dot_dimension_numbers<[1], [0], [0], [1], [0, 0, 1, 1], [], []>} : vector<16x9xf32>, vector<9x16xf32>, vector<16x16xf32> -> vector<16x16xf32>
    %106 = arith.subf %104, %105 : vector<16x16xf32>
    %107 = arith.negf %106 : vector<16x16xf32>
    %108 = math.exp %107 : vector<16x16xf32>
    %cst_74 = arith.constant 1.000000e+00 : f32
    %109 = vector.broadcast %cst_74 : f32 to vector<16x16xf32>
    %110 = arith.addf %109, %108 : vector<16x16xf32>
    %111 = arith.divf %109, %110 : vector<16x16xf32>
    %c0_75 = arith.constant 0 : index
    %c2_76 = arith.constant 2 : index
    %c0_77 = arith.constant 0 : index
    %c0_78 = arith.constant 0 : index
    %112 = vector.load %arg7[%c0_75, %c2_76, %c0_77, %c0_78] : memref<1x3x16x16xf32, #tpu.memory_space<vmem>>, vector<1x1x16x16xf32>
    %113 = vector.shape_cast %112 : vector<1x1x16x16xf32> to vector<16x16xf32>
    %114 = vector.shape_cast %111 : vector<16x16xf32> to vector<1x1x16x16xf32>
    tpu.vector_store %arg7[%c0_75, %c2_76, %c0_77, %c0_78], %114 {strides = array<i32>} : memref<1x3x16x16xf32, #tpu.memory_space<vmem>>, vector<1x1x16x16xf32>,
    return
  }
  func.func @transform_0(%arg0: i32) -> (i32, i32, i32, i32) {
    %c0_i32 = arith.constant 0 : i32
    %c0_i32_0 = arith.constant 0 : i32
    %c0_i32_1 = arith.constant 0 : i32
    %c0_i32_2 = arith.constant 0 : i32
    return %arg0, %c0_i32, %c0_i32_0, %c0_i32_1 : i32, i32, i32, i32
  }
  func.func @transform_1(%arg0: i32) -> (i32, i32, i32, i32) {
    %c0_i32 = arith.constant 0 : i32
    %c0_i32_0 = arith.constant 0 : i32
    %c0_i32_1 = arith.constant 0 : i32
    %c0_i32_2 = arith.constant 0 : i32
    return %arg0, %c0_i32, %c0_i32_0, %c0_i32_1 : i32, i32, i32, i32
  }
  func.func @transform_2(%arg0: i32) -> (i32, i32) {
    %c0_i32 = arith.constant 0 : i32
    %c0_i32_0 = arith.constant 0 : i32
    %c0_i32_1 = arith.constant 0 : i32
    return %c0_i32, %c0_i32_0 : i32, i32
  }
  func.func @transform_3(%arg0: i32) -> (i32, i32) {
    %c0_i32 = arith.constant 0 : i32
    %c0_i32_0 = arith.constant 0 : i32
    %c0_i32_1 = arith.constant 0 : i32
    return %c0_i32, %c0_i32_0 : i32, i32
  }
  func.func @transform_4(%arg0: i32) -> (i32, i32) {
    %c0_i32 = arith.constant 0 : i32
    %c0_i32_0 = arith.constant 0 : i32
    %c0_i32_1 = arith.constant 0 : i32
    return %c0_i32, %c0_i32_0 : i32, i32
  }
  func.func @transform_5(%arg0: i32) -> (i32, i32) {
    %c0_i32 = arith.constant 0 : i32
    %c0_i32_0 = arith.constant 0 : i32
    %c0_i32_1 = arith.constant 0 : i32
    return %c0_i32, %c0_i32_0 : i32, i32
  }
  func.func @transform_6(%arg0: i32) -> (i32, i32, i32, i32) {
    %c0_i32 = arith.constant 0 : i32
    %c0_i32_0 = arith.constant 0 : i32
    %c0_i32_1 = arith.constant 0 : i32
    %c0_i32_2 = arith.constant 0 : i32
    return %arg0, %c0_i32, %c0_i32_0, %c0_i32_1 : i32, i32, i32, i32
  }
}

</mosaic_0001>

<bundles_post_ra>
// kernel: custom-call.1
= control target key start
LH: loop header
LB: loop body
LE: loop exit
PB: predicated region body
PF: predicated region fallthrough
CT: control target
= control target key end

     0   :  { %s87_s0 = inlined_call_operand.vmem [shape: c64[1,3,16,9], index: 0, kind: input, shape index: {}]   ;;  %s88_s1 = inlined_call_operand.vmem [shape: f32[1,3,16,9], index: 1, kind: output, shape index: {}]  }
   0x1   :  { %v30_v0 = vld [vmem:[%s87_s0 + $0x30] sm:$0xff]  ;;  %v31_v1 = vld [vmem:[%s87_s0 + $0x38] sm:$0xff]  ;;  %v33_v2 = vld [vmem:[%s87_s0 + $0x40] sm:$0xff] }
   0x2   :  { %4 = vst [vmem:[%s88_s1] sm:$0xff] %v30_v0  ;;  %32 = vst [vmem:[%s88_s1 + $0x8] sm:$0xff] %v31_v1  ;;  %v35_v3 = vld [vmem:[%s87_s0 + $0x48] sm:$0xff]  ;;  %v37_v4 = vld [vmem:[%s87_s0 + $0x50] sm:$0xff] }
   0x3   :  { %34 = vst [vmem:[%s88_s1 + $0x10] sm:$0xff] %v33_v2  ;;  %v39_v5 = vld [vmem:[%s87_s0 + $0x58] sm:$0xff]  ;;  %36 = vst [vmem:[%s88_s1 + $0x18] sm:$0xff] %v35_v3 }
   0x4   :  { %38 = vst [vmem:[%s88_s1 + $0x20] sm:$0xff] %v37_v4  ;;  %40 = vst [vmem:[%s88_s1 + $0x28] sm:$0xff] %v39_v5 }

// kernel: custom-call
= control target key start
LH: loop header
LB: loop body
LE: loop exit
PB: predicated region body
PF: predicated region fallthrough
CT: control target
= control target key end

     0   :  { %s80_s0 = inlined_call_operand.vmem [shape: c64[1,3,16,9], index: 0, kind: input, shape index: {}]   ;;  %s81_s1 = inlined_call_operand.vmem [shape: f32[1,3,16,9], index: 1, kind: output, shape index: {}]  }
   0x1   :  { %v2_v0 = vld [vmem:[%s80_s0] sm:$0xff]  ;;  %v24_v1 = vld [vmem:[%s80_s0 + $0x8] sm:$0xff]  ;;  %v26_v2 = vld [vmem:[%s80_s0 + $0x10] sm:$0xff] }
   0x2   :  { %3 = vst [vmem:[%s81_s1] sm:$0xff] %v2_v0  ;;  %25 = vst [vmem:[%s81_s1 + $0x8] sm:$0xff] %v24_v1  ;;  %v28_v3 = vld [vmem:[%s80_s0 + $0x18] sm:$0xff]  ;;  %v30_v4 = vld [vmem:[%s80_s0 + $0x20] sm:$0xff] }
   0x3   :  { %27 = vst [vmem:[%s81_s1 + $0x10] sm:$0xff] %v26_v2  ;;  %v32_v5 = vld [vmem:[%s80_s0 + $0x28] sm:$0xff]  ;;  %29 = vst [vmem:[%s81_s1 + $0x18] sm:$0xff] %v28_v3 }
   0x4   :  { %31 = vst [vmem:[%s81_s1 + $0x20] sm:$0xff] %v30_v4  ;;  %33 = vst [vmem:[%s81_s1 + $0x28] sm:$0xff] %v32_v5 }

// kernel: _image_forward_jit.1
= control target key start
LH: loop header
LB: loop body
LE: loop exit
PB: predicated region body
PF: predicated region fallthrough
CT: control target
= control target key end

     0   :  { %vm68_vm0 = vcmask 130048   ;;  %s2177_s0 = inlined_call_operand.vmem [shape: f32[1,3,16,9], index: 0, kind: input, shape index: {}]   ;;  %s2178_s1 = inlined_call_operand.vmem [shape: f32[1,3,16,9], index: 1, kind: input, shape index: {}]   ;;  %s2179_s2 = inlined_call_operand.vmem [shape: f32[16,16], index: 2, kind: input, shape index: {}]   ;;  %s2180_s3 = inlined_call_operand.vmem [shape: f32[16,16], index: 3, kind: input, shape index: {}]   ;;  %s2181_s4 = inlined_call_operand.vmem [shape: f32[9,16], index: 4, kind: input, shape index: {}]   ;;  %s2182_s5 = inlined_call_operand.vmem [shape: f32[9,16], index: 5, kind: input, shape index: {}]   ;;  %s2183_s6 = inlined_call_operand.hbm [shape: f32[1,3,16,16], index: 6, kind: output, shape index: {}]  }
   0x1   :  { %v1927_v0 = vld [vmem:[%s2177_s0 + $0x8] sm:$0xff]  ;;  %v1932_v1 = vld [vmem:[%s2177_s0 + $0x18] sm:$0xff]  ;;  %v1963_v13 = vld [vmem:[%s2177_s0] sm:$0xff] }
   0x2   :  { %v1937_v2 = vld [vmem:[%s2177_s0 + $0x28] sm:$0xff]  ;;  %v49_v3 = vmul.f32 0.26, %v1927_v0  ;;  %v53_v4 = vmul.f32 0.09, %v1932_v1  ;;  %v1950_v7 = vld [vmem:[%s2178_s1 + $0x18] sm:$0xff] }
   0x3   :  { %v61_v5 = vmul.f32 0.02, %v1937_v2  ;;  %v1945_v6 = vld [vmem:[%s2178_s1 + $0x8] sm:$0xff]  ;;  %v57_v11 = vmul.f32 0.09, %v1950_v7  ;;  %v1968_v14 = vld [vmem:[%s2177_s0 + $0x10] sm:$0xff] }
   0x4   :  { %v1955_v8 = vld [vmem:[%s2178_s1 + $0x28] sm:$0xff]  ;;  %v55_v9 = vadd.f32 %v53_v4, %v49_v3  ;;  %v51_v10 = vmul.f32 0.26, %v1945_v6  ;;  %v1973_v15 = vld [vmem:[%s2177_s0 + $0x20] sm:$0xff]  ;;  %v48_v18 = vmul.f32 0.26, %v1963_v13 }
   0x5   :  { %v65_v12 = vmul.f32 0.02, %v1955_v8  ;;  %v52_v19 = vmul.f32 0.09, %v1968_v14  ;;  %v1980_v20 = vld [vmem:[%s2178_s1] sm:$0xff]  ;;  %v1985_v21 = vld [vmem:[%s2178_s1 + $0x10] sm:$0xff] }
   0x6   :  { %v63_v16 = vadd.f32 %v61_v5, %v55_v9  ;;  %v59_v17 = vadd.f32 %v57_v11, %v51_v10  ;;  %v60_v22 = vmul.f32 0.02, %v1973_v15  ;;  %v1991_v23 = vld [vmem:[%s2178_s1 + $0x20] sm:$0xff]  ;;  %v50_v24 = vmul.f32 0.26, %v1980_v20 }
   0x7   :  { %v1997_v25 = vld [vmem:[%s2179_s2] sm:$0xff]  ;;  %v54_v27 = vadd.f32 %v52_v19, %v48_v18  ;;  %v56_v28 = vmul.f32 0.09, %v1985_v21  ;;  %v64_v29 = vmul.f32 0.02, %v1991_v23 }
   0x8   :  { %1711 = vmatprep.subr.mxu0 %v63_v16  ;;  %v67_v26 = vadd.f32 %v65_v12, %v59_v17  ;;  %1715 = vmatprep.mubr.msk.f32.mxu0 %vm68_vm0, %v1997_v25  ;;  %v2006_v30 = vld [vmem:[%s2180_s3] sm:$0xff] }
   0x9   :  { %1712 = vmatpush3.msra.mxu0 %v63_v16  ;;  %1722 = vmatprep.mubr.msk.f32.mxu1 %vm68_vm0, %v2006_v30 }
   0xa   :  { %11 = vsyncpa [#allocation3], 0  ;;  %1718 = vmatprep.subr.mxu1 %v67_v26  ;;  %v62_v31 = vadd.f32 %v60_v22, %v54_v27  ;;  %v58_v32 = vadd.f32 %v56_v28, %v50_v24  ;;  %v2013_v33 = vld [vmem:[%s2179_s2 + $0x8] sm:$0xff]  ;;  %vm390_vm1 = vcmask 1040384   ;;  %v2040_v37 = vmul.f32 0.27, %v1927_v0 }
   0xb   :  { %1719 = vmatpush3.msra.mxu1 %v67_v26  ;;  %v2018_v35 = vld [vmem:[%s2180_s3 + $0x8] sm:$0xff]  ;;  %v574_v38 = vmul.f32 0.0, %v1932_v1  ;;  %v2048_v39 = vld [vmem:[%s2181_s4] sm:$0xff]  ;;  %v582_v41 = vmul.f32 -0.05, %v1937_v2  ;;  %v578_v44 = vmul.f32 0.0, %v1950_v7 }
   0xc   :  { %1713 = vmatprep.subr.mxu0 %v62_v31  ;;  %v66_v34 = vadd.f32 %v64_v29, %v58_v32  ;;  %v2035_v36 = vld [vmem:[%s2181_s4 + $0x8] sm:$0x1]  ;;  %v2054_v42 = vmul.f32 0.27, %v1945_v6  ;;  %v586_v46 = vmul.f32 -0.05, %v1955_v8 }
   0xd   :  { %1714 = vmatpush3.msra.mxu0 %v62_v31  ;;  %v576_v40 = vadd.f32 %v574_v38, %v2040_v37  ;;  %v2060_v43 = vld [vmem:[%s2182_s5 + $0x8] sm:$0x1]  ;;  %v2071_v47 = vld [vmem:[%s2182_s5] sm:$0xff]  ;;  %v2077_v50 = vmul.f32 0.27, %v1963_v13  ;;  %v573_v51 = vmul.f32 0.0, %v1968_v14 }
   0xe   :  { %1720 = vmatprep.subr.mxu1 %v66_v34  ;;  %1716 = vmatmul.mubr.msk.f32.vlgmr.msra.gmra.mxu0 %vm68_vm0, %v2013_v33  ;;  %v580_v48 = vadd.f32 %v578_v44, %v2054_v42  ;;  %v581_v56 = vmul.f32 -0.05, %v1973_v15  ;;  %v2083_v57 = vmul.f32 0.27, %v1980_v20  ;;  %v577_v58 = vmul.f32 0.0, %v1985_v21  ;;  %s1886_s5 = smov [#allocation2]  }
   0xf   :  { %1721 = vmatpush3.msra.mxu1 %v66_v34  ;;  %1725 = vmatprep.subr.mxu0 %v63_v16  ;;  %v584_v45 = vadd.f32 %v582_v41, %v576_v40  ;;  %v575_v55 = vadd.f32 %v573_v51, %v2077_v50  ;;  %vm383_vm2 = vcmask 72704   ;;  %v585_v4 = vmul.f32 -0.05, %v1991_v23  ;;  %s1572_s8 = sshll.u32 %s1886_s5, 4  ;;  %s1573_s8 = int_to_ptr.vmem [resolvable:$true] %s1572_s8 }
  0x10   :  { %1723 = vmatmul.mubr.msk.f32.vlgmr.msra.gmra.mxu1 %vm68_vm0, %v2018_v35  ;;  %1732 = vmatprep.subr.mxu1 %v67_v26  ;;  %v588_v49 = vadd.f32 %v586_v46, %v580_v48  ;;  %v579_v3 = vadd.f32 %v577_v58, %v2083_v57  ;;  %v1071_v12 = vmul.f32 -0.09, %v1932_v1  ;;  %v1075_v17 = vmul.f32 -0.09, %v1950_v7  ;;  %s1864_s9 = scalar_lea.vmem %s1573_s8, 768  ;;  %p1869_p1 = scmp.lt.s32.totalorder %s1573_s8, %s1573_s8 }
  0x11   :  { %1726 = vmatpush3.msra.mxu0 %v63_v16  ;;  %1733 = vmatpush3.msra.mxu1 %v67_v26  ;;  %v583_v62 = vadd.f32 %v581_v56, %v575_v55  ;;  %v1079_v16 = vmul.f32 0.03, %v1937_v2  ;;  %v1083_v20 = vmul.f32 0.03, %v1955_v8  ;;  %v1070_v1 = vmul.f32 -0.09, %v1968_v14  ;;  %p1865_p0 = scmp.ne.s32.totalorder %s1573_s8, %s1864_s9  ;;  %p1870_p2 = scmp.lt.s32.totalorder %s1864_s9, %s1864_s9 }
  0x12   :  { %1727 = vmatprep.subr.mxu0 %v62_v31  ;;  %1734 = vmatprep.subr.mxu1 %v66_v34  ;;  %v587_v11 = vadd.f32 %v585_v4, %v579_v3  ;;  %v1073_v13 = vadd.f32 %v1071_v12, %v2040_v37  ;;  %v1077_v19 = vadd.f32 %v1075_v17, %v2054_v42  ;;  %v1078_v38 = vmul.f32 0.03, %v1973_v15 }
  0x13   :  { %1728 = vmatpush3.msra.mxu0 %v62_v31  ;;  %1729 = vmatprep.mubr.msk.f32.mxu0 %vm68_vm0, %v2006_v30  ;;  %v1072_v37 = vadd.f32 %v1070_v1, %v2077_v50  ;;  %v1074_v40 = vmul.f32 -0.09, %v1985_v21  ;;  %p1871_p3 = por %p1870_p2, %p1869_p1 }
  0x14   :  { %1735 = vmatpush3.msra.mxu1 %v66_v34  ;;  %1736 = vmatprep.mubr.msk.f32.mxu1 %vm68_vm0, %v1997_v25  ;;  %v1081_v18 = vadd.f32 %v1079_v16, %v1073_v13  ;;  %v1085_v22 = vadd.f32 %v1083_v20, %v1077_v19 }
  0x15   :  { %1730 = vmatmul.mubr.msk.f32.vlgmr.msra.gmra.mxu0 %vm68_vm0, %v2018_v35  ;;  %1737 = vmatmul.mubr.msk.f32.vlgmr.msra.gmra.mxu1 %vm68_vm0, %v2013_v33  ;;  %v1080_v14 = vadd.f32 %v1078_v38, %v1072_v37  ;;  %v1076_v48 = vadd.f32 %v1074_v40, %v2083_v57  ;;  %p1872_p4 = pnand %p1871_p3, %p1865_p0 }
  0x16   :  { %1739 = vmatprep.subr.msk.mxu0 %vm390_vm1, %v2035_v36  ;;  %1746 = vmatprep.subr.msk.mxu1 %vm390_vm1, %v2060_v43 }
  0x17   :  { %1740 = vmatpush3.msk.msra.mxu0 %vm390_vm1, %v2035_v36  ;;  %1747 = vmatpush3.msk.msra.mxu1 %vm390_vm1, %v2060_v43 }
  0x18   :  { %1741 = vmatprep.subr.mxu0 %v2048_v39  ;;  %1748 = vmatprep.subr.mxu1 %v2071_v47 }
  0x19   :  { %1742 = vmatpush3.msra.mxu0 %v2048_v39  ;;  %1749 = vmatpush3.msra.mxu1 %v2071_v47 }
  0x1a   :  { %1753 = vmatprep.subr.mxu0 %v584_v45  ;;  %1760 = vmatprep.subr.mxu1 %v588_v49 }
  0xce   :  { %v1717_v52 = vpop.f32.mrf.mxu0 }
  0xd0   :  { %v1724_v53 = vpop.f32.mrf.mxu1  ;;  %v141_v54 = vpop.f32.mrf.mxu0 }
  0xd1   :  { %v232_v61 = vsub.f32 %v1717_v52, %v1724_v53 }
  0xd2   :  { %v222_v59 = vpop.f32.mrf.mxu1 }
  0xd3   :  { %v231_v60 = vsub.f32 %v141_v54, %v222_v59 }
  0xd5   :  { %v1731_v63 = vpop.f32.mrf.mxu0  ;;  %v1738_v0 = vpop.f32.mrf.mxu1  ;;  %1743 = vmatprep.mubr.msk.f32.mxu0 %vm383_vm2, %v231_v60 }
  0xd6   :  { %1744 = vmatmul.mubr.msk.f32.vlgmr.msra.gmra.mxu0 %vm383_vm2, %v232_v61  ;;  %v380_v10 = vadd.f32 %v1738_v0, %v1731_v63 }
  0xd7   :  { %v299_v5 = vpop.f32.mrf.mxu0  ;;  %v374_v6 = vpop.f32.mrf.mxu1  ;;  %1754 = vmatpush3.msra.mxu0 %v584_v45  ;;  %1757 = vmatprep.mubr.msk.f32.mxu0 %vm68_vm0, %v1997_v25 }
  0xd8   :  { %v375_v9 = vadd.f32 %v374_v6, %v299_v5  ;;  %1755 = vmatprep.subr.mxu0 %v583_v62 }
  0xd9   :  { %1756 = vmatpush3.msra.mxu0 %v583_v62 }
  0xda   :  { %1750 = vmatprep.mubr.msk.f32.mxu1 %vm383_vm2, %v375_v9  ;;  %1758 = vmatmul.mubr.msk.f32.vlgmr.msra.gmra.mxu0 %vm68_vm0, %v2013_v33 }
  0xdb   :  { %1751 = vmatmul.mubr.msk.f32.vlgmr.msra.gmra.mxu1 %vm383_vm2, %v380_v10  ;;  %1767 = vmatprep.subr.mxu0 %v584_v45 }
  0xdc   :  { %1761 = vmatpush3.msra.mxu1 %v588_v49  ;;  %1764 = vmatprep.mubr.msk.f32.mxu1 %vm68_vm0, %v2006_v30 }
  0xdd   :  { %1762 = vmatprep.subr.mxu1 %v587_v11  ;;  %1768 = vmatpush3.msra.mxu0 %v584_v45 }
  0xde   :  { %1763 = vmatpush3.msra.mxu1 %v587_v11  ;;  %1769 = vmatprep.subr.mxu0 %v583_v62 }
  0xdf   :  { %1765 = vmatmul.mubr.msk.f32.vlgmr.msra.gmra.mxu1 %vm68_vm0, %v2018_v35  ;;  %1774 = vmatprep.subr.mxu1 %v588_v49 }
  0xe0   :  { %1775 = vmatpush3.msra.mxu1 %v588_v49  ;;  %1770 = vmatpush3.msra.mxu0 %v583_v62  ;;  %v1082_v49 = vmul.f32 0.03, %v1991_v23 }
  0xe1   :  { %1771 = vmatprep.mubr.msk.f32.mxu0 %vm68_vm0, %v2006_v30  ;;  %1776 = vmatprep.subr.mxu1 %v587_v11 }
  0xe2   :  { %1772 = vmatmul.mubr.msk.f32.vlgmr.msra.gmra.mxu0 %vm68_vm0, %v2018_v35  ;;  %1777 = vmatpush3.msra.mxu1 %v587_v11  ;;  %v1084_v52 = vadd.f32 %v1082_v49, %v1076_v48 }
  0xe3   :  { %1778 = vmatprep.mubr.msk.f32.mxu1 %vm68_vm0, %v1997_v25  ;;  %1781 = vmatprep.subr.msk.mxu0 %vm390_vm1, %v2035_v36 }
  0xe4   :  { %1779 = vmatmul.mubr.msk.f32.vlgmr.msra.gmra.mxu1 %vm68_vm0, %v2013_v33  ;;  %1782 = vmatpush3.msk.msra.mxu0 %vm390_vm1, %v2035_v36 }
  0xe5   :  { %1783 = vmatprep.subr.mxu0 %v2048_v39  ;;  %1788 = vmatprep.subr.msk.mxu1 %vm390_vm1, %v2060_v43 }
  0xe6   :  { %1784 = vmatpush3.msra.mxu0 %v2048_v39  ;;  %1789 = vmatpush3.msk.msra.mxu1 %vm390_vm1, %v2060_v43 }
  0xe7   :  { %1790 = vmatprep.subr.mxu1 %v2071_v47  ;;  %1795 = vmatprep.subr.mxu0 %v1081_v18 }
  0xe8   :  { %1791 = vmatpush3.msra.mxu1 %v2071_v47 }
  0xe9   :  { %1802 = vmatprep.subr.mxu1 %v1085_v22 }
 0x196   :  { %v1745_v24 = vpop.f32.mrf.mxu0 }
 0x198   :  { %v460_v26 = vpop.f32.mrf.mxu0 }
 0x19a   :  { %v1759_v27 = vpop.f32.mrf.mxu0 }
 0x19b   :  { %v1752_v28 = vpop.f32.mrf.mxu1 }
 0x19c   :  { %v554_v29 = vsub.f32 %v1745_v24, %v1752_v28  ;;  %v655_v34 = vpop.f32.mrf.mxu0 }
 0x19d   :  { %v544_v31 = vpop.f32.mrf.mxu1 }
 0x19e   :  { %v1606_v32 = vmul.f32 -1.442695, %v554_v29  ;;  %v553_v2 = vsub.f32 %v460_v26, %v544_v31 }
 0x19f   :  { %v1766_v7 = vpop.f32.mrf.mxu1 }
 0x1a0   :  { %1840 = vpow2.f32 %v1606_v32  ;;  %v1605_v8 = vmul.f32 -1.442695, %v553_v2  ;;  %v740_v45 = vsub.f32 %v1759_v27, %v1766_v7 }
 0x1a1   :  { %v730_v41 = vpop.f32.mrf.mxu1 }
 0x1a2   :  { %1842 = vpow2.f32 %v1605_v8  ;;  %v739_v42 = vsub.f32 %v655_v34, %v730_v41  ;;  %v1773_v44 = vpop.f32.mrf.mxu0 }
 0x1a4   :  { %v1780_v46 = vpop.f32.mrf.mxu1  ;;  %1785 = vmatprep.mubr.msk.f32.mxu0 %vm383_vm2, %v739_v42  ;;  %v807_v15 = vpop.f32.mrf.mxu0 }
 0x1a5   :  { %1786 = vmatmul.mubr.msk.f32.vlgmr.msra.gmra.mxu0 %vm383_vm2, %v740_v45  ;;  %v888_v51 = vadd.f32 %v1780_v46, %v1773_v44 }
 0x1a6   :  { %v882_v50 = vpop.f32.mrf.mxu1  ;;  %1796 = vmatpush3.msra.mxu0 %v1081_v18  ;;  %1799 = vmatprep.mubr.msk.f32.mxu0 %vm68_vm0, %v1997_v25 }
 0x1a7   :  { %v883_v21 = vadd.f32 %v882_v50, %v807_v15  ;;  %1797 = vmatprep.subr.mxu0 %v1080_v14 }
 0x1a8   :  { %1798 = vmatpush3.msra.mxu0 %v1080_v14 }
 0x1a9   :  { %1792 = vmatprep.mubr.msk.f32.mxu1 %vm383_vm2, %v883_v21  ;;  %1800 = vmatmul.mubr.msk.f32.vlgmr.msra.gmra.mxu0 %vm68_vm0, %v2013_v33 }
 0x1aa   :  { %1793 = vmatmul.mubr.msk.f32.vlgmr.msra.gmra.mxu1 %vm383_vm2, %v888_v51  ;;  %1809 = vmatprep.subr.mxu0 %v1081_v18 }
 0x1ab   :  { %1803 = vmatpush3.msra.mxu1 %v1085_v22  ;;  %1806 = vmatprep.mubr.msk.f32.mxu1 %vm68_vm0, %v2006_v30 }
 0x1ac   :  { %1804 = vmatprep.subr.mxu1 %v1084_v52  ;;  %1810 = vmatpush3.msra.mxu0 %v1081_v18 }
 0x1ad   :  { %v1841_v23 = vpop.eup %1840  ;;  %1805 = vmatpush3.msra.mxu1 %v1084_v52  ;;  %1811 = vmatprep.subr.mxu0 %v1080_v14 }
 0x1ae   :  { %v562_v53 = vadd.f32 1.0, %v1841_v23  ;;  %1807 = vmatmul.mubr.msk.f32.vlgmr.msra.gmra.mxu1 %vm68_vm0, %v2018_v35  ;;  %1816 = vmatprep.subr.mxu1 %v1085_v22 }
 0x1af   :  { %v1843_v54 = vpop.eup %1842  ;;  %1817 = vmatpush3.msra.mxu1 %v1085_v22  ;;  %1812 = vmatpush3.msra.mxu0 %v1080_v14 }
 0x1b0   :  { %1844 = vrcp.f32 %v562_v53  ;;  %v561_v55 = vadd.f32 1.0, %v1843_v54  ;;  %1813 = vmatprep.mubr.msk.f32.mxu0 %vm68_vm0, %v2006_v30  ;;  %1818 = vmatprep.subr.mxu1 %v1084_v52 }
 0x1b1   :  { %1814 = vmatmul.mubr.msk.f32.vlgmr.msra.gmra.mxu0 %vm68_vm0, %v2018_v35  ;;  %1819 = vmatpush3.msra.mxu1 %v1084_v52 }
 0x1b2   :  { %1846 = vrcp.f32 %v561_v55  ;;  %1820 = vmatprep.mubr.msk.f32.mxu1 %vm68_vm0, %v1997_v25  ;;  %1823 = vmatprep.subr.msk.mxu0 %vm390_vm1, %v2035_v36 }
 0x1b3   :  { %1821 = vmatmul.mubr.msk.f32.vlgmr.msra.gmra.mxu1 %vm68_vm0, %v2013_v33  ;;  %1824 = vmatpush3.msk.msra.mxu0 %vm390_vm1, %v2035_v36 }
 0x1b4   :  { %1825 = vmatprep.subr.mxu0 %v2048_v39  ;;  %1830 = vmatprep.subr.msk.mxu1 %vm390_vm1, %v2060_v43 }
 0x1b5   :  { %1826 = vmatpush3.msra.mxu0 %v2048_v39  ;;  %1831 = vmatpush3.msk.msra.mxu1 %vm390_vm1, %v2060_v43 }
 0x1b6   :  { %1832 = vmatprep.subr.mxu1 %v2071_v47 }
 0x1b7   :  { %1833 = vmatpush3.msra.mxu1 %v2071_v47 }
 0x1bd   :  { %v1845_v25 = vpop.eup %1844 }
 0x1be   :  { %568 = vst.msk [vmem:[#allocation2 + $0x8] sm:$0xff] %vm68_vm0, %v1845_v25 }
 0x1bf   :  { %v1847_v30 = vpop.eup %1846 }
 0x1c0   :  { %567 = vst.msk [vmem:[#allocation2] sm:$0xff] %vm68_vm0, %v1847_v30 }
 0x265   :  { %v1787_v33 = vpop.f32.mrf.mxu0 }
 0x267   :  { %v963_v35 = vpop.f32.mrf.mxu0 }
 0x269   :  { %v1801_v36 = vpop.f32.mrf.mxu0 }
 0x26a   :  { %v1794_v56 = vpop.f32.mrf.mxu1 }
 0x26b   :  { %v1054_v57 = vsub.f32 %v1787_v33, %v1794_v56  ;;  %v1152_v60 = vpop.f32.mrf.mxu0 }
 0x26c   :  { %v1044_v58 = vpop.f32.mrf.mxu1 }
 0x26d   :  { %v1622_v39 = vmul.f32 -1.442695, %v1054_v57  ;;  %v1053_v59 = vsub.f32 %v963_v35, %v1044_v58 }
 0x26e   :  { %v1808_v43 = vpop.f32.mrf.mxu1 }
 0x26f   :  { %1848 = vpow2.f32 %v1622_v39  ;;  %v1621_v61 = vmul.f32 -1.442695, %v1053_v59  ;;  %v1237_v0 = vsub.f32 %v1801_v36, %v1808_v43 }
 0x270   :  { %v1227_v62 = vpop.f32.mrf.mxu1 }
 0x271   :  { %1850 = vpow2.f32 %v1621_v61  ;;  %v1236_v47 = vsub.f32 %v1152_v60, %v1227_v62  ;;  %v1815_v63 = vpop.f32.mrf.mxu0 }
 0x273   :  { %v1822_v3 = vpop.f32.mrf.mxu1  ;;  %1827 = vmatprep.mubr.msk.f32.mxu0 %vm383_vm2, %v1236_v47  ;;  %v1304_v4 = vpop.f32.mrf.mxu0 }
 0x274   :  { %1828 = vmatmul.mubr.msk.f32.vlgmr.msra.gmra.mxu0 %vm383_vm2, %v1237_v0  ;;  %v1385_v9 = vadd.f32 %v1822_v3, %v1815_v63 }
 0x275   :  { %v1379_v5 = vpop.f32.mrf.mxu1 }
 0x276   :  { %v1380_v6 = vadd.f32 %v1379_v5, %v1304_v4 }
 0x278   :  { %1834 = vmatprep.mubr.msk.f32.mxu1 %vm383_vm2, %v1380_v6 }
 0x279   :  { %1835 = vmatmul.mubr.msk.f32.vlgmr.msra.gmra.mxu1 %vm383_vm2, %v1385_v9 }
 0x27c   :  { %v1849_v10 = vpop.eup %1848 }
 0x27d   :  { %v1062_v11 = vadd.f32 1.0, %v1849_v10 }
 0x27e   :  { %v1851_v12 = vpop.eup %1850 }
 0x27f   :  { %1852 = vrcp.f32 %v1062_v11  ;;  %v1061_v13 = vadd.f32 1.0, %v1851_v12 }
 0x281   :  { %1854 = vrcp.f32 %v1061_v13 }
 0x28c   :  { %v1853_v16 = vpop.eup %1852 }
 0x28d   :  { %1069 = vst.msk [vmem:[#allocation2 + $0x18] sm:$0xff] %vm68_vm0, %v1853_v16 }
 0x28e   :  { %v1855_v17 = vpop.eup %1854 }
 0x28f   :  { %1068 = vst.msk [vmem:[#allocation2 + $0x10] sm:$0xff] %vm68_vm0, %v1855_v17 }
 0x334   :  { %v1829_v18 = vpop.f32.mrf.mxu0 }
 0x336   :  { %v1460_v22 = vpop.f32.mrf.mxu0 }
 0x339   :  { %v1836_v19 = vpop.f32.mrf.mxu1 }
 0x33a   :  { %v1551_v20 = vsub.f32 %v1829_v18, %v1836_v19 }
 0x33b   :  { %v1541_v24 = vpop.f32.mrf.mxu1 }
 0x33c   :  { %v1638_v26 = vmul.f32 -1.442695, %v1551_v20  ;;  %v1550_v27 = vsub.f32 %v1460_v22, %v1541_v24 }
 0x33e   :  { %1856 = vpow2.f32 %v1638_v26  ;;  %v1637_v28 = vmul.f32 -1.442695, %v1550_v27 }
 0x340   :  { %1858 = vpow2.f32 %v1637_v28 }
 0x34b   :  { %v1857_v1 = vpop.eup %1856 }
 0x34c   :  { %v1559_v29 = vadd.f32 1.0, %v1857_v1 }
 0x34d   :  { %v1859_v31 = vpop.eup %1858 }
 0x34e   :  { %1860 = vrcp.f32 %v1559_v29  ;;  %v1558_v32 = vadd.f32 1.0, %v1859_v31 }
 0x350   :  { %1862 = vrcp.f32 %v1558_v32 }
 0x35b   :  { %v1861_v2 = vpop.eup %1860 }
 0x35c   :  { %1566 = vst.msk [vmem:[#allocation2 + $0x28] sm:$0xff] %vm68_vm0, %v1861_v2 }
 0x35d   :  { %v1863_v34 = vpop.eup %1862 }
 0x35e   :  { %1565 = vst.msk [vmem:[#allocation2 + $0x20] sm:$0xff] %vm68_vm0, %v1863_v34 }
 0x35f   :  { %1875 = shalt.err (!%p1872_p4)
}
 0x360   :  { %s1887_s10 = smov 128   ;;  %s1888_s11 = smov 8  }
 0x361   :  { %1578 = dma.vmem_to_hbm [thread:$0]  %s1573_s8, 768, %s2183_s6, [#allocation3], %s1887_s10, %s1887_s10, %s1888_s11  }
 0x362   :  { %1884 = dma.done.wait [#allocation3], 768  }
 0x363   :  { %1885 = vsyncadd [#allocation3], 4294966528 }
 0x364   :  { %1582 = vsyncpa [#allocation3], 1 }

</bundles_post_ra>
